<compile_context>
chip_gen: v6e
topology: v6e:2x2x1
jax: 0.10.0
libtpu: 0.0.40
codegen_flags: <defaults>
</compile_context>

<pallas_src>
import math
import jax
import jax.numpy as jnp
from jax.experimental import pallas as pl
from jax.experimental.pallas import tpu as pltpu


def _round_up(x, m):
    return ((x + m - 1) // m) * m


def _vmem_capacity_bytes():
    """Physical VMEM per core; conservative fallback if the query is unavailable."""
    try:
        return int(pltpu.get_tpu_info().vmem_capacity_bytes)
    except Exception:
        return 64 * 1024 * 1024  # v7x per-TensorCore VMEM (smallest of v5e/v6e/v7x)


def policy_mlp_kernel(x_ref, w1_ref, b1_ref, w2_ref, b2_ref, out_ref):
    # hidden = relu(x @ W1 + b1)      (f32 accumulation, f32 bias + ReLU)
    h = jnp.dot(x_ref[...], w1_ref[...], preferred_element_type=jnp.float32)
    h = jnp.maximum(h + b1_ref[...].astype(jnp.float32), 0.0)
    # output = h @ W2 + b2            (unpadded, full-E minor dim)
    o = jnp.dot(h.astype(w2_ref.dtype), w2_ref[...],
                preferred_element_type=jnp.float32)
    o = o + b2_ref[...].astype(jnp.float32)
    out_ref[...] = o.astype(out_ref.dtype)


def policy_mlp_forward(state_query, w1, b1, w2, b2, *, block_b=None, out_dtype=None):
    """state_query: (B, D_in); returns (B, 1, ent_dim) like the PyTorch module.

    block_b: optional explicit batch-tile size (still clamped to the VMEM budget).
    out_dtype: dtype of the streamed output (defaults to state_query.dtype).
    """
    B, D_in = state_query.shape
    H = w1.shape[1]
    E = w2.shape[1]
    x_dtype = state_query.dtype
    out_dtype = x_dtype if out_dtype is None else out_dtype

    # ---- defensive bias layout: accept (H,) / (E,) nn.Linear-style biases --------------------
    b1 = jnp.reshape(b1, (1, H))
    b2 = jnp.reshape(b2, (1, E))

    # ---- per-generation VMEM budget (explicit, so larger tiles actually compile) -------------
    vmem_cap = _vmem_capacity_bytes()
    # <=64 MiB on v5e/v6e (128 MiB physical), ~38 MiB on v7x (64 MiB physical); leaves headroom.
    vmem_budget = min(64 << 20, (vmem_cap * 3) // 5)

    x_item = jnp.dtype(x_dtype).itemsize
    out_item = jnp.dtype(out_dtype).itemsize
    weight_bytes = sum(int(a.size) * jnp.dtype(a.dtype).itemsize for a in (w1, b1, w2, b2))

    # ---- batch tile size ----------------------------------------------------------------------
    # Double-buffered x + out tiles (plus double-buffered resident weights) must fit ~75% of the
    # budget; remaining slack covers layout padding / internal scratch.
    row_bytes = D_in * x_item + E * out_item
    avail = int(vmem_budget * 0.75) - 2 * weight_bytes
    tb_vmem = max(8, ((avail // (2 * row_bytes)) // 8) * 8)

    if block_b is not None:
        TB = min(_round_up(max(block_b, 8), 8), tb_vmem)
    else:
        # keep >=4 grid steps where B allows: work for both v7x TensorCores + bounded pad waste.
        tb_steps = _round_up(max(pl.cdiv(B, 4), 8), 8)
        TB = min(tb_vmem, tb_steps)
    TB = max(8, min(TB, _round_up(B, 8)))

    # ---- pad batch so every grid step sees a full (TB, ...) block ------------------------------
    B_pad = _round_up(B, TB)
    x = state_query
    if B_pad != B:
        x = jnp.pad(x, ((0, B_pad - B), (0, 0)))

    grid = (B_pad // TB,)

    flops = 2 * B_pad * (D_in * H + H * E)
    bytes_accessed = (B_pad * D_in * x_item + weight_bytes + B_pad * E * out_item)

    out = pl.pallas_call(
        policy_mlp_kernel,
        out_shape=jax.ShapeDtypeStruct((B_pad, E), out_dtype),
        grid_spec=pl.GridSpec(
            grid=grid,
            in_specs=[
                pl.BlockSpec((TB, D_in), lambda i: (i, 0)),   # x: streamed per batch tile
                pl.BlockSpec((D_in, H), lambda i: (0, 0)),    # W1: VMEM-resident
                pl.BlockSpec((1, H), lambda i: (0, 0)),       # b1: VMEM-resident
                pl.BlockSpec((H, E), lambda i: (0, 0)),       # W2: VMEM-resident (unpadded)
                pl.BlockSpec((1, E), lambda i: (0, 0)),       # b2: VMEM-resident (unpadded)
            ],
            out_specs=pl.BlockSpec((TB, E), lambda i: (i, 0)),
        ),
        compiler_params=pltpu.CompilerParams(
            dimension_semantics=("parallel",),                # v7x: shard batch tiles across 2 TCs
            vmem_limit_bytes=int(vmem_budget)),
        cost_estimate=pl.CostEstimate(
            flops=flops, transcendentals=0, bytes_accessed=bytes_accessed),
    )(x, w1, b1, w2, b2)

    # torch: self.mlp_l2(hidden).unsqueeze(1)  -> slice away batch padding, add the size-1 axis
    return out[:B, None, :]


def init_params(key, mlp_input_dim, mlp_hidden_dim, ent_dim, dtype=jnp.float32):
    """Deterministic init mimicking PyTorch nn.Linear default (uniform +/- 1/sqrt(fan_in))."""
    k1, k2, k3, k4 = jax.random.split(key, 4)
    bound1 = 1.0 / math.sqrt(mlp_input_dim)
    bound2 = 1.0 / math.sqrt(mlp_hidden_dim)
    # stored as (in_dim, out_dim) == PyTorch weight.T
    w1 = jax.random.uniform(k1, (mlp_input_dim, mlp_hidden_dim), dtype, -bound1, bound1)
    b1 = jax.random.uniform(k2, (mlp_hidden_dim,), dtype, -bound1, bound1)
    w2 = jax.random.uniform(k3, (mlp_hidden_dim, ent_dim), dtype, -bound2, bound2)
    b2 = jax.random.uniform(k4, (ent_dim,), dtype, -bound2, bound2)
    return w1, b1, w2, b2


if __name__ == "__main__":
    # Small shapes consistent with the module's forward.  batch=20 with the auto-derived tile
    # exercises the multi-tile grid (TB=8 -> 3 tiles) and the padded-batch tail path.
    config = dict(mlp_input_dim=32, mlp_hidden_dim=64, ent_dim=16)
    batch = 20

    key = jax.random.PRNGKey(0)
    kx, kp = jax.random.split(key)
    state_query = jax.random.normal(
        kx, (batch, config["mlp_input_dim"]), dtype=jnp.float32)
    w1, b1, w2, b2 = init_params(
        kp, config["mlp_input_dim"], config["mlp_hidden_dim"], config["ent_dim"])

    # Reference in plain JAX (same math as the PyTorch forward).
    ref = (jnp.maximum(state_query @ w1 + b1[None, :], 0.0) @ w2 + b2[None, :])[:, None, :]

    # 1) auto-derived tile size (multi-tile grid).
    out = policy_mlp_forward(state_query, w1, b1, w2, b2)
    out = jax.block_until_ready(out)
    assert out.shape == (batch, 1, config["ent_dim"])
    assert jnp.allclose(out, ref, atol=1e-5, rtol=1e-5)

    # 2) explicit tile covering the whole (padded) batch in one grid step.
    out2 = policy_mlp_forward(state_query, w1, b1, w2, b2, block_b=24)
    out2 = jax.block_until_ready(out2)
    assert jnp.allclose(out2, ref, atol=1e-5, rtol=1e-5)

    # 3) bf16 streaming path (halved HBM traffic; f32 accumulation inside the kernel).
    out_bf16 = policy_mlp_forward(
        state_query.astype(jnp.bfloat16),
        w1.astype(jnp.bfloat16), b1.astype(jnp.bfloat16),
        w2.astype(jnp.bfloat16), b2.astype(jnp.bfloat16),
        out_dtype=jnp.bfloat16)
    out_bf16 = jax.block_until_ready(out_bf16)
    assert jnp.allclose(out_bf16.astype(jnp.float32), ref, atol=1e-1, rtol=1e-1)

    print("KERNEL_OK")
</pallas_src>

<mosaic_0001>
module attributes {stable_mosaic.version = 11 : i64} {
  func.func @policy_mlp_kernel(%arg0: i32, %arg1: memref<8x32xf32, #tpu.memory_space<vmem>>, %arg2: memref<32x64xf32, #tpu.memory_space<vmem>>, %arg3: memref<1x64xf32, #tpu.memory_space<vmem>>, %arg4: memref<64x16xf32, #tpu.memory_space<vmem>>, %arg5: memref<1x16xf32, #tpu.memory_space<vmem>>, %arg6: memref<8x16xf32, #tpu.memory_space<vmem>>) attributes {dimension_semantics = [#tpu.dimension_semantics<parallel>], iteration_bounds = array<i64: 3>, scalar_prefetch = 0 : i64, scratch_operands = 0 : i64, tpu.core_type = #tpu.core_type<tc>, window_params = [{transform_indices = @transform_0, window_bounds = array<i64: 8, 32>}, {pipeline_mode = #tpu.pipeline_mode<synchronous>, transform_indices = @transform_1, window_bounds = array<i64: 32, 64>}, {pipeline_mode = #tpu.pipeline_mode<synchronous>, transform_indices = @transform_2, window_bounds = array<i64: 1, 64>}, {pipeline_mode = #tpu.pipeline_mode<synchronous>, transform_indices = @transform_3, window_bounds = array<i64: 64, 16>}, {pipeline_mode = #tpu.pipeline_mode<synchronous>, transform_indices = @transform_4, window_bounds = array<i64: 1, 16>}, {transform_indices = @transform_5, window_bounds = array<i64: 8, 16>}]} {
    %c0 = arith.constant 0 : index
    %c0_0 = arith.constant 0 : index
    %0 = vector.load %arg1[%c0, %c0_0] : memref<8x32xf32, #tpu.memory_space<vmem>>, vector<8x32xf32>
    %c0_1 = arith.constant 0 : index
    %c0_2 = arith.constant 0 : index
    %1 = vector.load %arg2[%c0_1, %c0_2] : memref<32x64xf32, #tpu.memory_space<vmem>>, vector<32x64xf32>
    %cst = arith.constant dense<0.000000e+00> : vector<8x64xf32>
    %2 = tpu.matmul %0, %1, %cst {dimension_numbers = #tpu.dot_dimension_numbers<[1], [0], [0], [1], [0, 0, 1, 1], [], []>} : vector<8x32xf32>, vector<32x64xf32>, vector<8x64xf32> -> vector<8x64xf32>
    %c0_3 = arith.constant 0 : index
    %c0_4 = arith.constant 0 : index
    %3 = vector.load %arg3[%c0_3, %c0_4] : memref<1x64xf32, #tpu.memory_space<vmem>>, vector<1x64xf32>
    %4 = vector.broadcast %3 : vector<1x64xf32> to vector<8x64xf32>
    %5 = arith.addf %2, %4 : vector<8x64xf32>
    %cst_5 = arith.constant 0.000000e+00 : f32
    %6 = vector.broadcast %cst_5 : f32 to vector<8x64xf32>
    %7 = arith.maximumf %5, %6 : vector<8x64xf32>
    %c0_6 = arith.constant 0 : index
    %c0_7 = arith.constant 0 : index
    %8 = vector.load %arg4[%c0_6, %c0_7] : memref<64x16xf32, #tpu.memory_space<vmem>>, vector<64x16xf32>
    %cst_8 = arith.constant dense<0.000000e+00> : vector<8x16xf32>
    %9 = tpu.matmul %7, %8, %cst_8 {dimension_numbers = #tpu.dot_dimension_numbers<[1], [0], [0], [1], [0, 0, 1, 1], [], []>} : vector<8x64xf32>, vector<64x16xf32>, vector<8x16xf32> -> vector<8x16xf32>
    %c0_9 = arith.constant 0 : index
    %c0_10 = arith.constant 0 : index
    %10 = vector.load %arg5[%c0_9, %c0_10] : memref<1x16xf32, #tpu.memory_space<vmem>>, vector<1x16xf32>
    %11 = vector.broadcast %10 : vector<1x16xf32> to vector<8x16xf32>
    %12 = arith.addf %9, %11 : vector<8x16xf32>
    %c0_11 = arith.constant 0 : index
    %c0_12 = arith.constant 0 : index
    %13 = vector.load %arg6[%c0_11, %c0_12] : memref<8x16xf32, #tpu.memory_space<vmem>>, vector<8x16xf32>
    tpu.vector_store %arg6[%c0_11, %c0_12], %12 {strides = array<i32>} : memref<8x16xf32, #tpu.memory_space<vmem>>, vector<8x16xf32>,
    return
  }
  func.func @transform_0(%arg0: i32) -> (i32, i32) {
    %c0_i32 = arith.constant 0 : i32
    %c0_i32_0 = arith.constant 0 : i32
    return %arg0, %c0_i32 : i32, i32
  }
  func.func @transform_1(%arg0: i32) -> (i32, i32) {
    %c0_i32 = arith.constant 0 : i32
    %c0_i32_0 = arith.constant 0 : i32
    %c0_i32_1 = arith.constant 0 : i32
    return %c0_i32, %c0_i32_0 : i32, i32
  }
  func.func @transform_2(%arg0: i32) -> (i32, i32) {
    %c0_i32 = arith.constant 0 : i32
    %c0_i32_0 = arith.constant 0 : i32
    %c0_i32_1 = arith.constant 0 : i32
    return %c0_i32, %c0_i32_0 : i32, i32
  }
  func.func @transform_3(%arg0: i32) -> (i32, i32) {
    %c0_i32 = arith.constant 0 : i32
    %c0_i32_0 = arith.constant 0 : i32
    %c0_i32_1 = arith.constant 0 : i32
    return %c0_i32, %c0_i32_0 : i32, i32
  }
  func.func @transform_4(%arg0: i32) -> (i32, i32) {
    %c0_i32 = arith.constant 0 : i32
    %c0_i32_0 = arith.constant 0 : i32
    %c0_i32_1 = arith.constant 0 : i32
    return %c0_i32, %c0_i32_0 : i32, i32
  }
  func.func @transform_5(%arg0: i32) -> (i32, i32) {
    %c0_i32 = arith.constant 0 : i32
    %c0_i32_0 = arith.constant 0 : i32
    return %arg0, %c0_i32 : i32, i32
  }
}

</mosaic_0001>

<bundles_post_ra>
// kernel: tpu_custom_call.1
= control target key start
LH: loop header
LB: loop body
LE: loop exit
PB: predicated region body
PF: predicated region fallthrough
CT: control target
= control target key end

     0   :  { %s558_s18 = smov 0   ;;  %s626_s0 = inlined_call_operand.vmem [shape: f32[24,32], index: 0, kind: input, shape index: {}]   ;;  %s627_s1 = inlined_call_operand.vmem [shape: f32[32,64], index: 1, kind: input, shape index: {}]   ;;  %s628_s2 = inlined_call_operand.vmem [shape: f32[1,64], index: 2, kind: input, shape index: {}]   ;;  %s629_s3 = inlined_call_operand.vmem [shape: f32[64,16], index: 3, kind: input, shape index: {}]   ;;  %s630_s4 = inlined_call_operand.vmem [shape: f32[1,16], index: 4, kind: input, shape index: {}]   ;;  %s631_s5 = inlined_call_operand.vmem [shape: f32[24,16], index: 5, kind: output, shape index: {}]  }
   0x1 LB: > { %s451_s19 = sadd.s32 4294967295, %s524_s18   ;;  %p455_p0 = scmp.ge.s32.totalorder %s524_s18, 1  ;;  %s524_s18 = sphi %s558_s18, %s15_s18  }
   0x2   : > { %p186_p1 = scmp.lt.s32.totalorder %s524_s18, 4 }
   0x4   : > { %p187_p2 = pnand %p455_p0, %p186_p1 }
   0x5   : > { %p212_p3 = scmp.lt.s32.totalorder (!%p187_p2), %s451_s19, 2 }
   0x6   : > { %190 = sbr.rel (%p187_p2) target bundleno = 413 (0x19d), region = 40 }
   0xb   : > { %v224_v0 = vld [vmem:[%s627_s1 + $0x18] sm:$0xff]  ;;  %v526_v1 = vmov 0.0   ;;  %v223_v2 = vld [vmem:[%s627_s1 + $0x10] sm:$0xff]  ;;  %vm527_vm0 = vmmov 0   ;;  %s633_s19 = smov (!%p212_p3, %s451_s19), 2  ;;  %v222_v5 = vld [vmem:[%s627_s1 + $0x8] sm:$0xff] }
   0xc   : > { %478 = vmatprep.subr.mxu0 %v526_v1  ;;  %486 = vmatprep.mubr.msk.f32.mxu0 %vm527_vm0, %v526_v1  ;;  %v314_v3 = vld [vmem:[%s629_s3 + $0x38] sm:$0xff]  ;;  %v313_v4 = vld [vmem:[%s629_s3 + $0x30] sm:$0xff]  ;;  %s456_s30 = sshll.u32 %s633_s19, 3  ;;  %v312_v6 = vld [vmem:[%s629_s3 + $0x28] sm:$0xff]  ;;  %vm232_vm1 = vcmask 261120   ;;  %vm322_vm2 = vcmask 523264  }
   0xd   : > { %479 = vmatpush3.msra.mxu0 %v224_v0  ;;  %489 = vmatprep.subr.mxu1 %v526_v1  ;;  %v221_v7 = vld [vmem:[%s627_s1] sm:$0xff]  ;;  %s215_s12 = scalar_lea.vmem %s626_s0, %s456_s30  ;;  %v310_v10 = vld [vmem:[%s629_s3 + $0x18] sm:$0xff]  ;;  %v309_v11 = vld [vmem:[%s629_s3 + $0x10] sm:$0xff]  ;;  %s219_s7 = scalar_lea.vmem %s631_s5, %s456_s30  ;;  %vm396_vm3 = vcmask 130048  }
   0xe   : > { %480 = vmatprep.subr.mxu0 %v526_v1  ;;  %490 = vmatpush3.msra.mxu1 %v314_v3  ;;  %v220_v8 = vld [vmem:[%s215_s12] sm:$0xff]  ;;  %v308_v12 = vld [vmem:[%s629_s3 + $0x8] sm:$0xff] }
   0xf   : > { %481 = vmatpush3.msra.mxu0 %v223_v2  ;;  %491 = vmatprep.subr.mxu1 %v526_v1  ;;  %v311_v9 = vld [vmem:[%s629_s3 + $0x20] sm:$0xff] }
  0x10   : > { %482 = vmatprep.subr.mxu0 %v526_v1  ;;  %492 = vmatpush3.msra.mxu1 %v313_v4  ;;  %v307_v13 = vld [vmem:[%s629_s3] sm:$0xff] }
  0x11   : > { %483 = vmatpush3.msra.mxu0 %v222_v5  ;;  %493 = vmatprep.subr.mxu1 %v526_v1  ;;  %v458_v14 = vld [vmem:[%s628_s2] ss:$0 sm:$0xff] }
  0x12   : > { %484 = vmatprep.subr.mxu0 %v526_v1  ;;  %494 = vmatpush3.msra.mxu1 %v312_v6  ;;  %v460_v19 = vld [vmem:[%s630_s4] ss:$0 sm:$0xff] }
  0x13   : > { %485 = vmatpush3.msra.mxu0 %v221_v7  ;;  %495 = vmatprep.subr.mxu1 %v526_v1 }
  0x14   : > { %487 = vmatmul.mubr.msk.f32.vlgmr.msra.gmra.mxu0 %vm232_vm1, %v220_v8  ;;  %496 = vmatpush3.msra.mxu1 %v311_v9 }
  0x15   : > { %497 = vmatprep.subr.mxu1 %v526_v1  ;;  %505 = vmatprep.mubr.msk.f32.mxu1 %vm527_vm0, %v526_v1 }
  0x16   : > { %498 = vmatpush3.msra.mxu1 %v310_v10 }
  0x17   : > { %499 = vmatprep.subr.mxu1 %v526_v1 }
  0x18   : > { %500 = vmatpush3.msra.mxu1 %v309_v11 }
  0x19   : > { %501 = vmatprep.subr.mxu1 %v526_v1 }
  0x1a   : > { %502 = vmatpush3.msra.mxu1 %v308_v12 }
  0x1b   : > { %503 = vmatprep.subr.mxu1 %v526_v1 }
  0x1c   : > { %504 = vmatpush3.msra.mxu1 %v307_v13 }
  0xd4   : > { %v302_v15 = vpop.f32.mrf.mxu0 }
  0xd5   : > { %v303_v16 = vadd.f32 %v458_v14, %v302_v15 }
  0xd6   : > { %v488_v17 = vpop.f32.mrf.mxu0 }
  0xd7   : > { %v306_v18 = vmax.f32 %v303_v16, 0.0 }
  0xd9   : > { %506 = vmatmul.mubr.msk.f32.vlgmr.msra.gmra.mxu1 %vm322_vm2, %v306_v18 }
 0x199   : > { %v392_v20 = vpop.f32.mrf.mxu1 }
 0x19a   : > { %v393_v21 = vadd.f32 %v460_v19, %v392_v20 }
 0x19b   : > { %v507_v22 = vpop.f32.mrf.mxu1 }
 0x19c   : > { %397 = vst.msk [vmem:[%s219_s7] sm:$0xff] %vm396_vm3, %v393_v21 }
 0x19d PF: > { %s15_s18 = sadd.s32 1, %s524_s18  }
 0x19e   : > { %p12_p4 = scmp.ge.s32.totalorder %s15_s18, 5  }
 0x1a0   :  { %14 = sbr.rel (!%p12_p4) target bundleno = 1 (0x1), region = 70 }

</bundles_post_ra>
